<compile_context>
chip_gen: v7x
topology: tpu7x:2x2x1
jax: 0.10.0
libtpu: 0.0.40
codegen_flags: <defaults>
</compile_context>

<pallas_src>
import jax
import jax.numpy as jnp
from jax.experimental import pallas as pl
from jax.experimental.pallas import tpu as pltpu

_LANE = 128                              # batch rows per lane-group (lane width)
_SUBLANE = 8
_TILE_QUANTUM = _LANE * _SUBLANE         # 1024: multi-tile row counts must be a multiple
_VMEM_BLOCK_BUDGET = 24 * 1024 * 1024    # target bytes for all double-buffered blocks
_VMEM_LIMIT_BYTES = 48 * 1024 * 1024     # explicit scoped-VMEM limit (safe on v5e/v6e/v7x)


def _round_up(x, m):
    return ((x + m - 1) // m) * m


def _round_down(x, m):
    return (x // m) * m


def _choose_tiling(batch, d, itemsize):
    """Pick (padded batch rows, rows per grid step) from D and a VMEM budget."""
    b_pad = _round_up(max(batch, _LANE), _LANE)
    # VMEM bytes per batch row, double-buffered; conservatively assume the narrow last
    # dim (D) is padded up to a full 128-lane tile inside VMEM.
    pad_d = _round_up(d, _LANE)
    per_row = 2 * 2 * pad_d * itemsize    # ue + ie input blocks, 2 pipeline buffers each
    per_row += 2 * 4 + 2 * 4              # s_T block + f32 output block, double-buffered
    tb = max(_TILE_QUANTUM,
             _round_down(_VMEM_BLOCK_BUDGET // per_row, _TILE_QUANTUM))
    if b_pad < 2 * _TILE_QUANTUM:
        # Small batch: a single tile (grid=(1,)).  Tiles below 1024 rows can't satisfy
        # the (8, 128) block-shape rule when multi-tiled, so no megacore split here.
        return b_pad, b_pad
    # Force >= 2 grid steps so the "parallel" batch axis can use both v7x TensorCores.
    tb = min(tb, _round_down(b_pad // 2, _TILE_QUANTUM))
    b_pad = _round_up(b_pad, tb)
    return b_pad, tb


def _tmf_kernel(ue_ref, ie_ref, st_ref, out_ref):
    # ue_ref, ie_ref: [TBR, 128, D]  (batch split into lane-groups of 128, D minor)
    # st_ref, out_ref: [TBR, 128]    (batch on lanes -> lane-dense, unmasked stores)
    ue = ue_ref[...].astype(jnp.float32)     # cast BEFORE accumulate (f32 accumulation)
    ie = ie_ref[...].astype(jnp.float32)
    score = jnp.sum(ue * ie, axis=-1)        # [TBR, 128]; D-reduce + relayout on XLU
    scaled = score * st_ref[...].astype(jnp.float32)
    out_ref[...] = jax.nn.sigmoid(scaled)    # EUP transcendental, lane-dense store


def tmf_fast_variety_forward(user_emb, item_emb, s_T, user, item, itemage):
    """user_emb: [n_users, D], item_emb: [n_items, D], s_T: [n_periods, 1] (any float
    dtype); user/item/itemage: int32 [B].  Returns float32 [B]."""
    B = user.shape[0]
    D = user_emb.shape[1]
    itemsize = jnp.dtype(user_emb.dtype).itemsize

    b_pad, tb = _choose_tiling(B, D, itemsize)
    pad = b_pad - B
    if pad:
        # Pad with index 0 (assumes non-empty tables, i.e. row 0 exists); the padded
        # outputs are sliced away below.
        user = jnp.pad(user, (0, pad))
        item = jnp.pad(item, (0, pad))
        itemage = jnp.pad(itemage, (0, pad))

    # Contiguous row gathers (no transposed table, no transposed HBM intermediate);
    # the reshape to [b_pad//128, 128, D] is a free row-major view.  Tables keep their
    # storage dtype (bf16 tables halve the dominant HBM traffic; f32 cast is in-kernel).
    ue = jnp.take(user_emb, user, axis=0).reshape(b_pad // _LANE, _LANE, D)
    ie = jnp.take(item_emb, item, axis=0).reshape(b_pad // _LANE, _LANE, D)
    st = jnp.take(s_T[:, 0], itemage, axis=0).reshape(b_pad // _LANE, _LANE)

    tbr = tb // _LANE
    grid = (b_pad // tb,)
    cost = pl.CostEstimate(
        flops=2 * b_pad * D,
        transcendentals=b_pad,
        bytes_accessed=2 * b_pad * D * itemsize + 2 * b_pad * 4,
    )

    out = pl.pallas_call(
        _tmf_kernel,
        out_shape=jax.ShapeDtypeStruct((b_pad // _LANE, _LANE), jnp.float32),
        grid_spec=pltpu.PrefetchScalarGridSpec(
            num_scalar_prefetch=0,
            grid=grid,
            in_specs=[
                pl.BlockSpec((tbr, _LANE, D), lambda i: (i, 0, 0)),
                pl.BlockSpec((tbr, _LANE, D), lambda i: (i, 0, 0)),
                pl.BlockSpec((tbr, _LANE), lambda i: (i, 0)),
            ],
            out_specs=pl.BlockSpec((tbr, _LANE), lambda i: (i, 0)),
        ),
        compiler_params=pltpu.CompilerParams(
            dimension_semantics=("parallel",),   # independent batch tiles (megacore)
            vmem_limit_bytes=_VMEM_LIMIT_BYTES,
        ),
        cost_estimate=cost,
    )(ue, ie, st)

    return out.reshape(-1)[:B]


def xavier_normal(key, shape):
    fan_out, fan_in = shape
    std = (2.0 / (fan_in + fan_out)) ** 0.5
    return std * jax.random.normal(key, shape, dtype=jnp.float32)


if __name__ == "__main__":
    # Small synthetic configuration (consistent with the module's __init__ shapes).
    n_users, n_items, n_periods, emb = 10, 12, 6, 32
    B = 8

    key = jax.random.PRNGKey(0)
    k_ue, k_ie, k_st, k_u, k_i, k_t = jax.random.split(key, 6)

    # Deterministic parameter init (xavier_normal_, as in _init_weights; n_factors = 1).
    user_embedding = xavier_normal(k_ue, (n_users, emb))
    item_embedding = xavier_normal(k_ie, (n_items, emb))
    s_T = xavier_normal(k_st, (n_periods, 1))

    user = jax.random.randint(k_u, (B,), 0, n_users, dtype=jnp.int32)
    item = jax.random.randint(k_i, (B,), 0, n_items, dtype=jnp.int32)
    itemage = jax.random.randint(k_t, (B,), 0, n_periods, dtype=jnp.int32)

    fwd = jax.jit(tmf_fast_variety_forward)
    out = jax.block_until_ready(
        fwd(user_embedding, item_embedding, s_T, user, item, itemage))

    # Pure-JAX reference check of the forward semantics.
    ref = jax.nn.sigmoid(
        jnp.sum(user_embedding[user] * item_embedding[item], axis=-1).astype(jnp.float32)
        * s_T[itemage, 0].astype(jnp.float32))
    assert out.shape == (B,)
    assert jnp.allclose(out, ref, atol=1e-5, rtol=1e-5)

    print("KERNEL_OK")
</pallas_src>

<mosaic_0001>
module attributes {stable_mosaic.version = 11 : i64} {
  func.func @_tmf_kernel(%arg0: i32, %arg1: memref<1x128x32xf32, #tpu.memory_space<vmem>>, %arg2: memref<1x128x32xf32, #tpu.memory_space<vmem>>, %arg3: memref<1x128xf32, #tpu.memory_space<vmem>>, %arg4: memref<1x128xf32, #tpu.memory_space<vmem>>) attributes {dimension_semantics = [#tpu.dimension_semantics<parallel>], iteration_bounds = array<i64: 1>, scalar_prefetch = 0 : i64, scratch_operands = 0 : i64, tpu.core_type = #tpu.core_type<tc>, window_params = [{transform_indices = @transform_0, window_bounds = array<i64: 1, 128, 32>}, {transform_indices = @transform_1, window_bounds = array<i64: 1, 128, 32>}, {transform_indices = @transform_2, window_bounds = array<i64: 1, 128>}, {transform_indices = @transform_3, window_bounds = array<i64: 1, 128>}]} {
    %c0 = arith.constant 0 : index
    %c0_0 = arith.constant 0 : index
    %c0_1 = arith.constant 0 : index
    %0 = vector.load %arg1[%c0, %c0_0, %c0_1] : memref<1x128x32xf32, #tpu.memory_space<vmem>>, vector<1x128x32xf32>
    %c0_2 = arith.constant 0 : index
    %c0_3 = arith.constant 0 : index
    %c0_4 = arith.constant 0 : index
    %1 = vector.load %arg2[%c0_2, %c0_3, %c0_4] : memref<1x128x32xf32, #tpu.memory_space<vmem>>, vector<1x128x32xf32>
    %2 = arith.mulf %0, %1 : vector<1x128x32xf32>
    %cst = arith.constant dense<0.000000e+00> : vector<1x128xf32>
    %3 = vector.multi_reduction <add>, %2, %cst [2] : vector<1x128x32xf32> to vector<1x128xf32>
    %c0_5 = arith.constant 0 : index
    %c0_6 = arith.constant 0 : index
    %4 = vector.load %arg3[%c0_5, %c0_6] : memref<1x128xf32, #tpu.memory_space<vmem>>, vector<1x128xf32>
    %5 = arith.mulf %3, %4 : vector<1x128xf32>
    %6 = arith.negf %5 : vector<1x128xf32>
    %7 = math.exp %6 : vector<1x128xf32>
    %cst_7 = arith.constant 1.000000e+00 : f32
    %8 = vector.broadcast %cst_7 : f32 to vector<1x128xf32>
    %9 = arith.addf %8, %7 : vector<1x128xf32>
    %10 = arith.divf %8, %9 : vector<1x128xf32>
    %c0_8 = arith.constant 0 : index
    %c0_9 = arith.constant 0 : index
    %11 = vector.load %arg4[%c0_8, %c0_9] : memref<1x128xf32, #tpu.memory_space<vmem>>, vector<1x128xf32>
    tpu.vector_store %arg4[%c0_8, %c0_9], %10 {strides = array<i32>} : memref<1x128xf32, #tpu.memory_space<vmem>>, vector<1x128xf32>,
    return
  }
  func.func @transform_0(%arg0: i32) -> (i32, i32, i32) {
    %c0_i32 = arith.constant 0 : i32
    %c0_i32_0 = arith.constant 0 : i32
    %c0_i32_1 = arith.constant 0 : i32
    return %arg0, %c0_i32, %c0_i32_0 : i32, i32, i32
  }
  func.func @transform_1(%arg0: i32) -> (i32, i32, i32) {
    %c0_i32 = arith.constant 0 : i32
    %c0_i32_0 = arith.constant 0 : i32
    %c0_i32_1 = arith.constant 0 : i32
    return %arg0, %c0_i32, %c0_i32_0 : i32, i32, i32
  }
  func.func @transform_2(%arg0: i32) -> (i32, i32) {
    %c0_i32 = arith.constant 0 : i32
    %c0_i32_0 = arith.constant 0 : i32
    return %arg0, %c0_i32 : i32, i32
  }
  func.func @transform_3(%arg0: i32) -> (i32, i32) {
    %c0_i32 = arith.constant 0 : i32
    %c0_i32_0 = arith.constant 0 : i32
    return %arg0, %c0_i32 : i32, i32
  }
}

</mosaic_0001>

<bundles_post_ra>
// kernel: tmf_fast_variety_forward.1
= control target key start
LH: loop header
LB: loop body
LE: loop exit
PB: predicated region body
PF: predicated region fallthrough
CT: control target
= control target key end

     0   :  { %vm62_vm0 = vcmask 261120   ;;  %vm383_vm1 = vcmask 130112   ;;  %vm390_vm2 = vcmask 195712   ;;  %vm397_vm3 = vcmask 261312   ;;  %s760_s0 = inlined_call_operand.vmem [shape: f32[1,128,32], index: 0, kind: input, shape index: {}]   ;;  %s761_s1 = inlined_call_operand.vmem [shape: f32[1,128,32], index: 1, kind: input, shape index: {}]   ;;  %s762_s2 = inlined_call_operand.vmem [shape: f32[1,128], index: 2, kind: input, shape index: {}]   ;;  %s763_s3 = inlined_call_operand.vmem [shape: f32[1,128], index: 3, kind: output, shape index: {}]  }
   0x1   :  { %v16_v0 = vld [vmem:[%s760_s0 + $0x10] sm:$0xff]  ;;  %v14_v2 = vld [vmem:[%s760_s0] sm:$0xff]  ;;  %v17_v5 = vld [vmem:[%s760_s0 + $0x18] sm:$0xff]  ;;  %vm404_vm4 = vcmask 326912   ;;  %vm411_vm5 = vcmask 392512   ;;  %vm418_vm6 = vcmask 458112  }
   0x2   :  { %v32_v1 = vld [vmem:[%s761_s1 + $0x10] sm:$0xff]  ;;  %v30_v4 = vld [vmem:[%s761_s1] sm:$0xff]  ;;  %v33_v6 = vld [vmem:[%s761_s1 + $0x18] sm:$0xff]  ;;  %vm425_vm7 = vcmask 523712   ;;  %vm432_vm8 = vcmask 589312   ;;  %vm439_vm9 = vcmask 654912  }
   0x3   :  { %v48_v3 = vmul.f32 %v32_v1, %v16_v0  ;;  %v46_v7 = vmul.f32 %v30_v4, %v14_v2  ;;  %v49_v8 = vmul.f32 %v33_v6, %v17_v5  ;;  %v15_v9 = vld [vmem:[%s760_s0 + $0x8] sm:$0xff]  ;;  %v18_v15 = vld [vmem:[%s760_s0 + $0x20] sm:$0xff]  ;;  %v21_v22 = vld [vmem:[%s760_s0 + $0x38] sm:$0xff]  ;;  %v573_v1 = vmov 0  }
   0x4   :  { %v31_v10 = vld [vmem:[%s761_s1 + $0x8] sm:$0xff]  ;;  %v34_v16 = vld [vmem:[%s761_s1 + $0x20] sm:$0xff]  ;;  %v37_v23 = vld [vmem:[%s761_s1 + $0x38] sm:$0xff]  ;;  %508 = vset.pattern.permute.xlu1 %v573_v1  ;;  %507 = vset.pattern.permute.xlu0 %v573_v1  ;;  %vm446_vm10 = vcmask 720512   ;;  %vm453_vm11 = vcmask 786112   ;;  %vm460_vm12 = vcmask 851712  }
   0x5   :  { %v19_v11 = vld [vmem:[%s760_s0 + $0x28] sm:$0xff]  ;;  %v69_v12 = vsel %vm62_vm0, %v48_v3, 0.0  ;;  %v47_v13 = vmul.f32 %v31_v10, %v15_v9  ;;  %v63_v17 = vsel %vm62_vm0, %v46_v7, 0.0  ;;  %v72_v18 = vsel %vm62_vm0, %v49_v8, 0.0  ;;  %v20_v24 = vld [vmem:[%s760_s0 + $0x30] sm:$0xff]  ;;  %v22_v32 = vld [vmem:[%s760_s0 + $0x40] sm:$0xff] }
   0x6   :  { %v35_v14 = vld [vmem:[%s761_s1 + $0x28] sm:$0xff]  ;;  %70 = vadd.xlane.f32.xlu1 %v69_v12  ;;  %64 = vadd.xlane.f32.xlu0 %v63_v17  ;;  %v50_v21 = vmul.f32 %v34_v16, %v18_v15  ;;  %v36_v25 = vld [vmem:[%s761_s1 + $0x30] sm:$0xff]  ;;  %v53_v27 = vmul.f32 %v37_v23, %v21_v22  ;;  %v38_v33 = vld [vmem:[%s761_s1 + $0x40] sm:$0xff]  ;;  %vm467_vm13 = vcmask 917312   ;;  %vm474_vm14 = vcmask 982912  }
   0x7   :  { %v51_v19 = vmul.f32 %v35_v14, %v19_v11  ;;  %v66_v20 = vsel %vm62_vm0, %v47_v13, 0.0  ;;  %v52_v29 = vmul.f32 %v36_v25, %v20_v24  ;;  %v23_v30 = vld [vmem:[%s760_s0 + $0x48] sm:$0xff]  ;;  %v54_v37 = vmul.f32 %v38_v33, %v22_v32  ;;  %v25_v38 = vld [vmem:[%s760_s0 + $0x58] sm:$0xff]  ;;  %v24_v40 = vld [vmem:[%s760_s0 + $0x50] sm:$0xff] }
   0x8   :  { %v75_v28 = vsel %vm62_vm0, %v50_v21, 0.0  ;;  %v39_v31 = vld [vmem:[%s761_s1 + $0x48] sm:$0xff]  ;;  %v84_v34 = vsel %vm62_vm0, %v53_v27, 0.0  ;;  %v41_v39 = vld [vmem:[%s761_s1 + $0x58] sm:$0xff]  ;;  %v40_v41 = vld [vmem:[%s761_s1 + $0x50] sm:$0xff]  ;;  %vm481_vm15 = vcmask 1048512  }
   0x9   :  { %v78_v26 = vsel %vm62_vm0, %v51_v19, 0.0  ;;  %v55_v35 = vmul.f32 %v39_v31, %v23_v30  ;;  %v81_v36 = vsel %vm62_vm0, %v52_v29, 0.0  ;;  %v57_v43 = vmul.f32 %v41_v39, %v25_v38  ;;  %v27_v46 = vld [vmem:[%s760_s0 + $0x68] sm:$0xff]  ;;  %v26_v48 = vld [vmem:[%s760_s0 + $0x60] sm:$0xff]  ;;  %v29_v54 = vld [vmem:[%s760_s0 + $0x78] sm:$0xff] }
   0xa   :  { %73 = vadd.xlane.f32.xlu1 %v72_v18  ;;  %67 = vadd.xlane.f32.xlu0 %v66_v20  ;;  %v87_v44 = vsel %vm62_vm0, %v54_v37, 0.0  ;;  %v56_v45 = vmul.f32 %v40_v41, %v24_v40  ;;  %v43_v47 = vld [vmem:[%s761_s1 + $0x68] sm:$0xff]  ;;  %v42_v49 = vld [vmem:[%s761_s1 + $0x60] sm:$0xff]  ;;  %v45_v55 = vld [vmem:[%s761_s1 + $0x78] sm:$0xff] }
   0xb   :  { %v90_v42 = vsel %vm62_vm0, %v55_v35, 0.0  ;;  %v96_v50 = vsel %vm62_vm0, %v57_v43, 0.0  ;;  %v59_v51 = vmul.f32 %v43_v47, %v27_v46  ;;  %v58_v53 = vmul.f32 %v42_v49, %v26_v48  ;;  %v28_v56 = vld [vmem:[%s760_s0 + $0x70] sm:$0xff]  ;;  %v489_v0 = vld [vmem:[%s762_s2] ss:$0 sm:$0xff] }
   0xc   :  { %v93_v52 = vsel %vm62_vm0, %v56_v45, 0.0  ;;  %v44_v57 = vld [vmem:[%s761_s1 + $0x70] sm:$0xff]  ;;  %v61_v59 = vmul.f32 %v45_v55, %v29_v54 }
   0xd   :  { %v102_v58 = vsel %vm62_vm0, %v59_v51, 0.0  ;;  %v99_v60 = vsel %vm62_vm0, %v58_v53, 0.0  ;;  %v60_v61 = vmul.f32 %v44_v57, %v28_v56 }
   0xe   :  { %79 = vadd.xlane.f32.xlu1 %v78_v26  ;;  %76 = vadd.xlane.f32.xlu0 %v75_v28  ;;  %v108_v62 = vsel %vm62_vm0, %v61_v59, 0.0 }
   0xf   :  { %v105_v63 = vsel %vm62_vm0, %v60_v61, 0.0 }
  0x12   :  { %85 = vadd.xlane.f32.xlu1 %v84_v34  ;;  %82 = vadd.xlane.f32.xlu0 %v81_v36 }
  0x16   :  { %91 = vadd.xlane.f32.xlu1 %v90_v42  ;;  %88 = vadd.xlane.f32.xlu0 %v87_v44 }
  0x1a   :  { %97 = vadd.xlane.f32.xlu1 %v96_v50  ;;  %94 = vadd.xlane.f32.xlu0 %v93_v52 }
  0x1e   :  { %103 = vadd.xlane.f32.xlu1 %v102_v58  ;;  %100 = vadd.xlane.f32.xlu0 %v99_v60 }
  0x22   :  { %109 = vadd.xlane.f32.xlu1 %v108_v62  ;;  %106 = vadd.xlane.f32.xlu0 %v105_v63 }
  0x33   :  { %122 = vbcast.lane.b32.xlu1 %v489_v0, 264 }
  0x37   :  { %126 = vbcast.lane.b32.xlu1 %v489_v0, 272 }
  0x38   :  { %118 = vbcast.lane.b32.xlu0 %v489_v0, 256 }
  0x3b   :  { %130 = vbcast.lane.b32.xlu1 %v489_v0, 280 }
  0x3c   :  { %134 = vbcast.lane.b32.xlu0 %v489_v0, 288 }
  0x3f   :  { %138 = vbcast.lane.b32.xlu1 %v489_v0, 296 }
  0x40   :  { %142 = vbcast.lane.b32.xlu0 %v489_v0, 304 }
  0x43   :  { %146 = vbcast.lane.b32.xlu1 %v489_v0, 312 }
  0x44   :  { %150 = vbcast.lane.b32.xlu0 %v489_v0, 320 }
  0x47   :  { %154 = vbcast.lane.b32.xlu1 %v489_v0, 328 }
  0x48   :  { %158 = vbcast.lane.b32.xlu0 %v489_v0, 336 }
  0x4b   :  { %162 = vbcast.lane.b32.xlu1 %v489_v0, 344 }
  0x4c   :  { %166 = vbcast.lane.b32.xlu0 %v489_v0, 352 }
  0x4f   :  { %170 = vbcast.lane.b32.xlu1 %v489_v0, 360 }
  0x50   :  { %174 = vbcast.lane.b32.xlu0 %v489_v0, 368 }
  0x53   :  { %178 = vbcast.lane.b32.xlu1 %v489_v0, 376 }
  0x93   :  { %v71_v2 = vpop.xlane.xlu1 %70  ;;  %v65_v3 = vpop.xlane.xlu0 %64 }
  0x97   :  { %v74_v4 = vpop.xlane.xlu1 %73  ;;  %v68_v5 = vpop.xlane.xlu0 %67 }
  0x9b   :  { %v80_v6 = vpop.xlane.xlu1 %79  ;;  %v77_v7 = vpop.xlane.xlu0 %76 }
  0x9f   :  { %v86_v8 = vpop.xlane.xlu1 %85  ;;  %v83_v9 = vpop.xlane.xlu0 %82 }
  0xa3   :  { %v92_v10 = vpop.xlane.xlu1 %91  ;;  %v89_v11 = vpop.xlane.xlu0 %88 }
  0xa7   :  { %v709_v12 = vpop.xlane.xlu1 %97  ;;  %v95_v13 = vpop.xlane.xlu0 %94 }
  0xab   :  { %v711_v14 = vpop.xlane.xlu1 %103  ;;  %v101_v15 = vpop.xlane.xlu0 %100 }
  0xaf   :  { %v713_v16 = vpop.xlane.xlu1 %109  ;;  %v715_v17 = vpop.xlane.xlu0 %106 }
  0xb3   :  { %v123_v18 = vpop.permute.xlu1 %122  ;;  %v119_v20 = vpop.permute.xlu0 %118 }
  0xb4   :  { %v197_v19 = vmul.f32 %v123_v18, %v68_v5  ;;  %v196_v21 = vmul.f32 %v119_v20, %v65_v3 }
  0xb6   :  { %v491_v22 = vmul.f32 -1.442695, %v197_v19  ;;  %v490_v23 = vmul.f32 -1.442695, %v196_v21 }
  0xb7   :  { %v127_v24 = vpop.permute.xlu1 %126  ;;  %v135_v26 = vpop.permute.xlu0 %134 }
  0xb8   :  { %509 = vpow2.f32 %v491_v22  ;;  %v198_v25 = vmul.f32 %v127_v24, %v71_v2  ;;  %v200_v27 = vmul.f32 %v135_v26, %v77_v7 }
  0xb9   :  { %511 = vpow2.f32 %v490_v23 }
  0xba   :  { %v492_v28 = vmul.f32 -1.442695, %v198_v25  ;;  %v494_v29 = vmul.f32 -1.442695, %v200_v27 }
  0xbb   :  { %v131_v30 = vpop.permute.xlu1 %130  ;;  %v143_v32 = vpop.permute.xlu0 %142 }
  0xbc   :  { %513 = vpow2.f32 %v492_v28  ;;  %v199_v31 = vmul.f32 %v131_v30, %v74_v4  ;;  %v202_v33 = vmul.f32 %v143_v32, %v83_v9 }
  0xbd   :  { %515 = vpow2.f32 %v494_v29 }
  0xbe   :  { %v493_v34 = vmul.f32 -1.442695, %v199_v31  ;;  %v496_v35 = vmul.f32 -1.442695, %v202_v33 }
  0xbf   :  { %v139_v36 = vpop.permute.xlu1 %138  ;;  %v151_v38 = vpop.permute.xlu0 %150 }
  0xc0   :  { %517 = vpow2.f32 %v493_v34  ;;  %v201_v37 = vmul.f32 %v139_v36, %v80_v6  ;;  %v204_v39 = vmul.f32 %v151_v38, %v89_v11 }
  0xc1   :  { %519 = vpow2.f32 %v496_v35 }
  0xc2   :  { %v510_v40 = vpop.eup %509  ;;  %v495_v41 = vmul.f32 -1.442695, %v201_v37  ;;  %v498_v44 = vmul.f32 -1.442695, %v204_v39 }
  0xc3   :  { %v512_v42 = vpop.eup %511  ;;  %v261_v43 = vadd.f32 1.0, %v510_v40  ;;  %v147_v45 = vpop.permute.xlu1 %146 }
  0xc4   :  { %v260_v46 = vadd.f32 1.0, %v512_v42  ;;  %521 = vpow2.f32 %v495_v41  ;;  %v203_v47 = vmul.f32 %v147_v45, %v86_v8  ;;  %v159_v48 = vpop.permute.xlu0 %158 }
  0xc5   :  { %523 = vrcp.f32 %v261_v43  ;;  %v206_v49 = vmul.f32 %v159_v48, %v95_v13 }
  0xc6   :  { %v514_v50 = vpop.eup %513  ;;  %525 = vrcp.f32 %v260_v46  ;;  %v497_v51 = vmul.f32 -1.442695, %v203_v47 }
  0xc7   :  { %v516_v52 = vpop.eup %515  ;;  %v262_v53 = vadd.f32 1.0, %v514_v50  ;;  %527 = vpow2.f32 %v498_v44  ;;  %v500_v54 = vmul.f32 -1.442695, %v206_v49  ;;  %v155_v55 = vpop.permute.xlu1 %154  ;;  %v372_v50 = vlaneseq }
  0xc8   :  { %v264_v56 = vadd.f32 1.0, %v516_v52  ;;  %529 = vpow2.f32 %v497_v51  ;;  %v205_v57 = vmul.f32 %v155_v55, %v92_v10  ;;  %v167_v58 = vpop.permute.xlu0 %166 }
  0xc9   :  { %531 = vrcp.f32 %v262_v53  ;;  %v208_v59 = vmul.f32 %v167_v58, %v101_v15  ;;  %v721_v51 = vand.u32 127, %v372_v50  ;;  %v723_v52 = vshrl.u32 %v372_v50, 7 }
  0xca   :  { %v518_v60 = vpop.eup %517  ;;  %533 = vrcp.f32 %v264_v56  ;;  %v499_v61 = vmul.f32 -1.442695, %v205_v57 }
  0xcb   :  { %v520_v62 = vpop.eup %519  ;;  %v263_v63 = vadd.f32 1.0, %v518_v60  ;;  %535 = vpow2.f32 %v500_v54  ;;  %v502_v0 = vmul.f32 -1.442695, %v208_v59  ;;  %v163_v1 = vpop.permute.xlu1 %162  ;;  %v378_v53 = vadd.s32 4294967288, %v721_v51 }
  0xcc   :  { %v266_v2 = vadd.f32 1.0, %v520_v62  ;;  %537 = vpow2.f32 %v499_v61  ;;  %v207_v3 = vmul.f32 %v163_v1, %v709_v12  ;;  %v175_v4 = vpop.permute.xlu0 %174  ;;  %v385_v55 = vadd.s32 4294967280, %v721_v51 }
  0xcd   :  { %539 = vrcp.f32 %v263_v63  ;;  %v210_v5 = vmul.f32 %v175_v4, %v715_v17  ;;  %v392_v56 = vadd.s32 4294967272, %v721_v51  ;;  %v381_v57 = vsub.s32 %v378_v53, %v723_v52 }
  0xce   :  { %v522_v6 = vpop.eup %521  ;;  %541 = vrcp.f32 %v266_v2  ;;  %v501_v7 = vmul.f32 -1.442695, %v207_v3  ;;  %v376_v58 = vsub.s32 %v721_v51, %v723_v52  ;;  %v388_v60 = vsub.s32 %v385_v55, %v723_v52 }
  0xcf   :  { %v524_v8 = vpop.eup %523  ;;  %v265_v9 = vadd.f32 1.0, %v522_v6  ;;  %543 = vpow2.f32 %v502_v0  ;;  %v504_v10 = vmul.f32 -1.442695, %v210_v5  ;;  %v171_v11 = vpop.permute.xlu1 %170  ;;  %v399_v62 = vadd.s32 4294967264, %v721_v51 }
  0xd0   :  { %v526_v13 = vpop.eup %525  ;;  %545 = vpow2.f32 %v501_v7  ;;  %v209_v15 = vmul.f32 %v171_v11, %v711_v14  ;;  %328 = vperm.xlu1 %508, %v524_v8   ;;  %v395_v63 = vsub.s32 %v392_v56, %v723_v52  ;;  %v406_v0 = vadd.s32 4294967256, %v721_v51 }
  0xd1   :  { %v528_v18 = vpop.eup %527  ;;  %547 = vrcp.f32 %v265_v9  ;;  %325 = vperm.xlu0 %507, %v526_v13   ;;  %v402_v4 = vsub.s32 %v399_v62, %v723_v52  ;;  %v413_v7 = vadd.s32 4294967248, %v721_v51  ;;  %v427_v13 = vadd.s32 4294967232, %v721_v51 }
  0xd2   :  { %v530_v12 = vpop.eup %529  ;;  %v268_v19 = vadd.f32 1.0, %v528_v18  ;;  %549 = vpow2.f32 %v504_v10  ;;  %v503_v17 = vmul.f32 -1.442695, %v209_v15  ;;  %v409_v9 = vsub.s32 %v406_v0, %v723_v52 }
  0xd3   :  { %v532_v20 = vpop.eup %531  ;;  %v267_v21 = vadd.f32 1.0, %v530_v12  ;;  %v179_v22 = vpop.permute.xlu1 %178  ;;  %v420_v10 = vadd.s32 4294967240, %v721_v51  ;;  %v416_v12 = vsub.s32 %v413_v7, %v723_v52  ;;  %v476_v53 = vadd.s32 4294967176, %v721_v51 }
  0xd4   :  { %v534_v23 = vpop.eup %533  ;;  %551 = vrcp.f32 %v268_v19  ;;  %v211_v24 = vmul.f32 %v179_v22, %v713_v16  ;;  %331 = vperm.xlu1 %508, %v532_v20  }
  0xd5   :  { %v536_v25 = vpop.eup %535  ;;  %553 = vrcp.f32 %v267_v21  ;;  %v423_v22 = vsub.s32 %v420_v10, %v723_v52 }
  0xd6   :  { %v538_v26 = vpop.eup %537  ;;  %v270_v14 = vadd.f32 1.0, %v536_v25  ;;  %555 = vpow2.f32 %v503_v17  ;;  %v505_v27 = vmul.f32 -1.442695, %v211_v24  ;;  %v430_v24 = vsub.s32 %v427_v13, %v723_v52 }
  0xd7   :  { %v540_v28 = vpop.eup %539  ;;  %v269_v29 = vadd.f32 1.0, %v538_v26 }
  0xd8   :  { %v542_v30 = vpop.eup %541  ;;  %557 = vrcp.f32 %v270_v14  ;;  %334 = vperm.xlu0 %507, %v540_v28   ;;  %337 = vperm.xlu1 %508, %v534_v23   ;;  %v434_v23 = vadd.s32 4294967224, %v721_v51  ;;  %v441_v28 = vadd.s32 4294967216, %v721_v51 }
  0xd9   :  { %v544_v31 = vpop.eup %543  ;;  %559 = vrcp.f32 %v269_v29 }
  0xda   :  { %v546_v32 = vpop.eup %545  ;;  %v272_v33 = vadd.f32 1.0, %v544_v31  ;;  %561 = vpow2.f32 %v505_v27  ;;  %v437_v31 = vsub.s32 %v434_v23, %v723_v52 }
  0xdb   :  { %v548_v34 = vpop.eup %547  ;;  %v271_v16 = vadd.f32 1.0, %v546_v32  ;;  %v448_v32 = vadd.s32 4294967208, %v721_v51 }
  0xdc   :  { %v550_v35 = vpop.eup %549  ;;  %563 = vrcp.f32 %v272_v33  ;;  %340 = vperm.xlu0 %507, %v548_v34   ;;  %343 = vperm.xlu1 %508, %v542_v30  }
  0xdd   :  { %565 = vrcp.f32 %v271_v16  ;;  %v274_v36 = vadd.f32 1.0, %v550_v35  ;;  %v444_v16 = vsub.s32 %v441_v28, %v723_v52 }
  0xde   :  { %v552_v37 = vpop.eup %551 }
  0xdf   :  { %v554_v38 = vpop.eup %553  ;;  %567 = vrcp.f32 %v274_v36 }
  0xe0   :  { %v556_v39 = vpop.eup %555  ;;  %346 = vperm.xlu0 %507, %v554_v38   ;;  %349 = vperm.xlu1 %508, %v552_v37   ;;  %v455_v37 = vadd.s32 4294967200, %v721_v51 }
  0xe1   :  { %v273_v40 = vadd.f32 1.0, %v556_v39 }
  0xe2   :  { %v558_v41 = vpop.eup %557 }
  0xe3   :  { %v560_v42 = vpop.eup %559  ;;  %569 = vrcp.f32 %v273_v40  ;;  %v451_v40 = vsub.s32 %v448_v32, %v723_v52 }
  0xe4   :  { %v562_v43 = vpop.eup %561  ;;  %352 = vperm.xlu0 %507, %v560_v42   ;;  %355 = vperm.xlu1 %508, %v558_v41   ;;  %v462_v41 = vadd.s32 4294967192, %v721_v51 }
  0xe5   :  { %v275_v44 = vadd.f32 1.0, %v562_v43 }
  0xe6   :  { %v564_v45 = vpop.eup %563  ;;  %v465_v50 = vsub.s32 %v462_v41, %v723_v52 }
  0xe7   :  { %v566_v46 = vpop.eup %565  ;;  %571 = vrcp.f32 %v275_v44  ;;  %v458_v44 = vsub.s32 %v455_v37, %v723_v52 }
  0xe8   :  { %358 = vperm.xlu0 %507, %v566_v46   ;;  %361 = vperm.xlu1 %508, %v564_v45  }
  0xe9   :  { %v568_v47 = vpop.eup %567 }
  0xec   :  { %367 = vperm.xlu1 %508, %v568_v47   ;;  %v469_v47 = vadd.s32 4294967184, %v721_v51 }
  0xed   :  { %v570_v48 = vpop.eup %569 }
  0xee   :  { %364 = vperm.xlu0 %507, %v570_v48   ;;  %v472_v56 = vsub.s32 %v469_v47, %v723_v52 }
  0xf1   :  { %v572_v49 = vpop.eup %571 }
  0xf2   :  { %370 = vperm.xlu0 %507, %v572_v49  }
 0x14f   :  { %v329_v54 = vpop.permute.xlu1 %328 }
 0x150   :  { %v326_v59 = vpop.permute.xlu0 %325  ;;  %v382_v1 = vrot.slane %v329_v54, %v381_v57 }
 0x151   :  { %v377_v2 = vrot.slane %v326_v59, %v376_v58 }
 0x153   :  { %v332_v61 = vpop.permute.xlu1 %331  ;;  %v384_v11 = vsel %vm383_vm1, %v382_v1, %v377_v2 }
 0x154   :  { %v389_v3 = vrot.slane %v332_v61, %v388_v60  ;;  %v479_v61 = vsub.s32 %v476_v53, %v723_v52 }
 0x156   :  { %v391_v15 = vsel %vm390_vm2, %v389_v3, %v384_v11 }
 0x157   :  { %v338_v5 = vpop.permute.xlu1 %337  ;;  %v335_v6 = vpop.permute.xlu0 %334 }
 0x158   :  { %v396_v8 = vrot.slane %v335_v6, %v395_v63  ;;  %v403_v18 = vrot.slane %v338_v5, %v402_v4 }
 0x15a   :  { %v398_v20 = vsel %vm397_vm3, %v396_v8, %v391_v15 }
 0x15b   :  { %v344_v19 = vpop.permute.xlu1 %343  ;;  %v341_v17 = vpop.permute.xlu0 %340  ;;  %v405_v26 = vsel %vm404_vm4, %v403_v18, %v398_v20 }
 0x15c   :  { %v410_v21 = vrot.slane %v341_v17, %v409_v9  ;;  %v417_v25 = vrot.slane %v344_v19, %v416_v12 }
 0x15e   :  { %v412_v29 = vsel %vm411_vm5, %v410_v21, %v405_v26 }
 0x15f   :  { %v350_v14 = vpop.permute.xlu1 %349  ;;  %v347_v27 = vpop.permute.xlu0 %346  ;;  %v419_v34 = vsel %vm418_vm6, %v417_v25, %v412_v29 }
 0x160   :  { %v424_v30 = vrot.slane %v347_v27, %v423_v22  ;;  %v431_v33 = vrot.slane %v350_v14, %v430_v24 }
 0x162   :  { %v426_v38 = vsel %vm425_vm7, %v424_v30, %v419_v34 }
 0x163   :  { %v356_v35 = vpop.permute.xlu1 %355  ;;  %v353_v36 = vpop.permute.xlu0 %352  ;;  %v433_v43 = vsel %vm432_vm8, %v431_v33, %v426_v38 }
 0x164   :  { %v438_v39 = vrot.slane %v353_v36, %v437_v31  ;;  %v445_v42 = vrot.slane %v356_v35, %v444_v16 }
 0x166   :  { %v440_v48 = vsel %vm439_vm9, %v438_v39, %v433_v43 }
 0x167   :  { %v362_v45 = vpop.permute.xlu1 %361  ;;  %v359_v46 = vpop.permute.xlu0 %358  ;;  %v447_v55 = vsel %vm446_vm10, %v445_v42, %v440_v48 }
 0x168   :  { %v452_v49 = vrot.slane %v359_v46, %v451_v40  ;;  %v459_v54 = vrot.slane %v362_v45, %v458_v44 }
 0x16a   :  { %v454_v57 = vsel %vm453_vm11, %v452_v49, %v447_v55 }
 0x16b   :  { %v368_v58 = vpop.permute.xlu1 %367  ;;  %v461_v63 = vsel %vm460_vm12, %v459_v54, %v454_v57 }
 0x16c   :  { %v473_v62 = vrot.slane %v368_v58, %v472_v56 }
 0x16d   :  { %v365_v59 = vpop.permute.xlu0 %364 }
 0x16e   :  { %v466_v60 = vrot.slane %v365_v59, %v465_v50 }
 0x170   :  { %v468_v0 = vsel %vm467_vm13, %v466_v60, %v461_v63 }
 0x171   :  { %v371_v1 = vpop.permute.xlu0 %370  ;;  %v475_v51 = vsel %vm474_vm14, %v473_v62, %v468_v0 }
 0x172   :  { %v480_v2 = vrot.slane %v371_v1, %v479_v61 }
 0x174   :  { %v482_v3 = vsel %vm481_vm15, %v480_v2, %v475_v51 }
 0x175   :  { %484 = vst [vmem:[%s763_s3] sm:$0x1] %v482_v3 }

</bundles_post_ra>
